<compile_context>
chip_gen: v7x
topology: tpu7x:2x2x1
jax: 0.10.0
libtpu: 0.0.40
codegen_flags: <defaults>
</compile_context>

<pallas_src>
import numpy as np
import jax
import jax.numpy as jnp
from jax.experimental import pallas as pl
from jax.experimental.pallas import tpu as pltpu


def _cdiv(a, b):
    return -(-a // b)


def _sublane_align(itemsize):
    # sub-32-bit dtypes pack 2/4 rows per sublane -> larger minimum row tiles
    return 8 * max(1, 4 // max(int(itemsize), 1))


def _tpu_config():
    """(per-input-tile byte budget, scoped-VMEM limit or None) by generation."""
    kind = ""
    try:
        kind = jax.devices()[0].device_kind.lower()
    except Exception:
        pass
    if "v7" in kind:
        return 8 << 20, 48 << 20          # 64 MiB physical VMEM: leave headroom
    if "v6" in kind:
        return 8 << 20, 64 << 20          # 128 MiB physical, 32 MiB default scoped
    if "v5 lite" in kind or "v5e" in kind:
        return 4 << 20, 32 << 20          # slower HBM; default scoped is only 16 MiB
    return 4 << 20, None                  # conservative default (fits default scoped)


def _compiler_params(semantics, vmem_limit):
    if vmem_limit is None:
        return pltpu.CompilerParams(dimension_semantics=semantics)
    return pltpu.CompilerParams(dimension_semantics=semantics,
                                vmem_limit_bytes=vmem_limit)


# --------------------------------------------------------------------------
# Kernel bodies (built as closures over static tiling parameters).
# --------------------------------------------------------------------------

def _make_sublane_kernel(inv_k, K, TK, use_acc):
    """Input block (TL, TK, TN); reduce over axis 1; output block (TL, TN)."""
    needs_mask = (K % TK) != 0

    def kernel(x_ref, o_ref, *scratch):
        acc_ref = scratch[0] if use_acc else o_ref
        k = pl.program_id(2)

        @pl.when(k == 0)
        def _init():
            acc_ref[...] = jnp.zeros_like(acc_ref)

        x = x_ref[...]
        if needs_mask:
            rem = K - k * TK
            idx = jax.lax.broadcasted_iota(jnp.int32, x.shape, 1)
            x = jnp.where(idx < rem, x, jnp.zeros_like(x))
        acc_ref[...] += jnp.sum(x, axis=1, dtype=jnp.float32)

        @pl.when(k == pl.num_programs(2) - 1)
        def _finalize():
            if use_acc:
                o_ref[...] = (acc_ref[...] * inv_k).astype(o_ref.dtype)
            else:
                o_ref[...] = o_ref[...] * inv_k

    return kernel


def _make_lane_dense_kernel(inv_k, K, TK, use_acc):
    """Input block (TMB, 128, TK); reduce over last axis; output (TMB, 128)."""
    needs_mask = (K % TK) != 0

    def kernel(x_ref, o_ref, *scratch):
        acc_ref = scratch[0] if use_acc else o_ref
        k = pl.program_id(1)

        @pl.when(k == 0)
        def _init():
            acc_ref[...] = jnp.zeros_like(acc_ref)

        x = x_ref[...]
        if needs_mask:
            rem = K - k * TK
            idx = jax.lax.broadcasted_iota(jnp.int32, x.shape, 2)
            x = jnp.where(idx < rem, x, jnp.zeros_like(x))
        acc_ref[...] += jnp.sum(x, axis=-1, dtype=jnp.float32)

        @pl.when(k == pl.num_programs(1) - 1)
        def _finalize():
            if use_acc:
                o_ref[...] = (acc_ref[...] * inv_k).astype(o_ref.dtype)
            else:
                o_ref[...] = o_ref[...] * inv_k

    return kernel


def _make_lane_fallback_kernel(inv_k, K, TK, use_acc):
    """Input block (TM, TK); reduce over last axis; output (TM, 1)."""
    needs_mask = (K % TK) != 0

    def kernel(x_ref, o_ref, *scratch):
        acc_ref = scratch[0] if use_acc else o_ref
        k = pl.program_id(1)

        @pl.when(k == 0)
        def _init():
            acc_ref[...] = jnp.zeros_like(acc_ref)

        x = x_ref[...]
        if needs_mask:
            rem = K - k * TK
            idx = jax.lax.broadcasted_iota(jnp.int32, x.shape, 1)
            x = jnp.where(idx < rem, x, jnp.zeros_like(x))
        acc_ref[...] += jnp.sum(x, axis=-1, keepdims=True, dtype=jnp.float32)

        @pl.when(k == pl.num_programs(1) - 1)
        def _finalize():
            if use_acc:
                o_ref[...] = (acc_ref[...] * inv_k).astype(o_ref.dtype)
            else:
                o_ref[...] = o_ref[...] * inv_k

    return kernel


# --------------------------------------------------------------------------
# Wrapper
# --------------------------------------------------------------------------

def reduce_mean(x, dim):
    """Pallas equivalent of torch.mean(x, dim=dim) (keepdim=False)."""
    x = jnp.asarray(x)
    ndim = x.ndim
    dim = dim % ndim
    shape = tuple(int(s) for s in x.shape)
    K = shape[dim]
    out_dims = shape[:dim] + shape[dim + 1:]
    dtype = x.dtype
    itemsize = jnp.dtype(dtype).itemsize

    tile_bytes, vmem_limit = _tpu_config()
    budget_elems = max(tile_bytes // itemsize, 1)
    s_align = _sublane_align(itemsize)
    inv_k = float(1.0 / K)
    use_acc = jnp.dtype(dtype) != jnp.dtype(jnp.float32)

    L = int(np.prod(shape[:dim], dtype=np.int64)) if dim > 0 else 1
    N = int(np.prod(shape[dim + 1:], dtype=np.int64)) if dim < ndim - 1 else 1

    if N == 1:
        # -------- reduction over the (effectively) last axis --------
        M = L
        if M % 128 == 0 and M >= 128:
            # Lane-dense output path: view rows as (MB, 128) so output stores
            # are full 128-lane vectors.
            MB = M // 128
            x3 = x.reshape(MB, 128, K)

            tmb_min = min(MB, s_align)
            tk_budget = max(budget_elems // (128 * tmb_min), 128)
            if K <= tk_budget:
                TK = K                                   # full dim -> legal
            else:
                TK = max((tk_budget // 128) * 128, 128)  # 128-aligned, tail masked
            tmb_budget = max(budget_elems // (128 * TK), 1)
            if MB <= tmb_budget:
                TMB = MB
            else:
                TMB = min(max((tmb_budget // s_align) * s_align, s_align), MB)
            # >= 2 blocks on the parallel axis (v7x megacore) when cheap.
            if (_cdiv(MB, TMB) == 1 and TMB % (2 * s_align) == 0
                    and TMB * 128 * TK * itemsize >= (1 << 20)):
                TMB //= 2

            grid = (_cdiv(MB, TMB), _cdiv(K, TK))
            kernel = _make_lane_dense_kernel(inv_k, K, TK, use_acc)
            scratch = [pltpu.VMEM((TMB, 128), jnp.float32)] if use_acc else []

            out = pl.pallas_call(
                kernel,
                out_shape=jax.ShapeDtypeStruct((MB, 128), dtype),
                grid_spec=pltpu.PrefetchScalarGridSpec(
                    num_scalar_prefetch=0,
                    grid=grid,
                    in_specs=[pl.BlockSpec((TMB, 128, TK),
                                           lambda m, k: (m, 0, k))],
                    out_specs=pl.BlockSpec((TMB, 128), lambda m, k: (m, 0)),
                    scratch_shapes=scratch,
                ),
                compiler_params=_compiler_params(("parallel", "arbitrary"),
                                                 vmem_limit),
            )(x3)
            return out.reshape(out_dims)

        # Fallback for M % 128 != 0 (output is (M, 1); masked lane stores).
        # TODO(synk): could also lane-pack this path for very large M.
        x2 = x.reshape(M, K)
        tm_min = min(M, s_align)
        tk_budget = max(budget_elems // tm_min, 128)
        if K <= tk_budget:
            TK = K
        else:
            TK = max((tk_budget // 128) * 128, 128)
        tm_budget = max(budget_elems // TK, 1)
        if M <= tm_budget:
            TM = M
        else:
            TM = min(max((tm_budget // s_align) * s_align, s_align), M)
        if (_cdiv(M, TM) == 1 and TM % (2 * s_align) == 0
                and TM * TK * itemsize >= (1 << 20)):
            TM //= 2

        grid = (_cdiv(M, TM), _cdiv(K, TK))
        kernel = _make_lane_fallback_kernel(inv_k, K, TK, use_acc)
        scratch = [pltpu.VMEM((TM, 1), jnp.float32)] if use_acc else []

        out = pl.pallas_call(
            kernel,
            out_shape=jax.ShapeDtypeStruct((M, 1), dtype),
            grid_spec=pltpu.PrefetchScalarGridSpec(
                num_scalar_prefetch=0,
                grid=grid,
                in_specs=[pl.BlockSpec((TM, TK), lambda m, k: (m, k))],
                out_specs=pl.BlockSpec((TM, 1), lambda m, k: (m, 0)),
                scratch_shapes=scratch,
            ),
            compiler_params=_compiler_params(("parallel", "arbitrary"),
                                             vmem_limit),
        )(x2)
        return out.reshape(out_dims)

    # -------- general case: keep layout, reduce over the sublane axis --------
    x3 = x.reshape(L, K, N)

    # Apportion the tile budget TN -> TK -> TL, reserving room so the later
    # alignment floors can never overshoot the budget.
    tl_min = min(L, s_align)
    tn_budget = max(budget_elems // (s_align * tl_min), 128)
    if N <= 128 or N <= tn_budget:
        TN = N                                            # full dim -> legal
    else:
        TN = max((tn_budget // 128) * 128, 128)           # padded lanes discarded

    tk_budget = max(budget_elems // (TN * tl_min), 1)
    if K <= tk_budget:
        TK = K
    else:
        TK = min(max((tk_budget // s_align) * s_align, s_align), K)

    tl_budget = max(budget_elems // (TN * TK), 1)
    if L <= tl_budget:
        TL = L
    else:
        TL = min(max((tl_budget // s_align) * s_align, s_align), L)

    # Guarantee >= 2 blocks across the parallel axes (v7x has 2 TensorCores)
    # when the tile is big enough that the extra grid step is negligible.
    if (_cdiv(L, TL) == 1 and _cdiv(N, TN) == 1
            and TL * TK * TN * itemsize >= (1 << 20)):
        if TN % 256 == 0:
            TN //= 2
        elif TL % (2 * s_align) == 0:
            TL //= 2

    grid = (_cdiv(L, TL), _cdiv(N, TN), _cdiv(K, TK))
    kernel = _make_sublane_kernel(inv_k, K, TK, use_acc)
    scratch = [pltpu.VMEM((TL, TN), jnp.float32)] if use_acc else []

    out = pl.pallas_call(
        kernel,
        out_shape=jax.ShapeDtypeStruct((L, N), dtype),
        grid_spec=pltpu.PrefetchScalarGridSpec(
            num_scalar_prefetch=0,
            grid=grid,
            in_specs=[pl.BlockSpec((TL, TK, TN), lambda l, n, k: (l, k, n))],
            out_specs=pl.BlockSpec((TL, TN), lambda l, n, k: (l, n)),
            scratch_shapes=scratch,
        ),
        compiler_params=_compiler_params(("parallel", "parallel", "arbitrary"),
                                         vmem_limit),
    )(x3)
    return out.reshape(out_dims)


if __name__ == "__main__":
    key = jax.random.PRNGKey(0)
    # NCHW input, reduce over dim=1 (channels), matching ReduceMean(dim=1).
    B, C, H, W = 2, 4, 16, 16
    x = jax.random.normal(key, (B, C, H, W), dtype=jnp.float32)

    dim = 1
    y = jax.block_until_ready(reduce_mean(x, dim))
    y_ref = jnp.mean(x, axis=dim)
    assert y.shape == y_ref.shape, (y.shape, y_ref.shape)
    np.testing.assert_allclose(np.asarray(y), np.asarray(y_ref),
                               rtol=1e-6, atol=1e-6)

    # Last-axis reduction (lane-dense output path).
    y2 = jax.block_until_ready(reduce_mean(x, -1))
    y2_ref = jnp.mean(x, axis=-1)
    assert y2.shape == y2_ref.shape, (y2.shape, y2_ref.shape)
    np.testing.assert_allclose(np.asarray(y2), np.asarray(y2_ref),
                               rtol=1e-6, atol=1e-6)

    # bf16 exercises the separate-f32-accumulator (use_acc) path.
    xb = x.astype(jnp.bfloat16)
    y3 = jax.block_until_ready(reduce_mean(xb, 1))
    y3_ref = jnp.mean(xb.astype(jnp.float32), axis=1).astype(jnp.bfloat16)
    assert y3.shape == y3_ref.shape, (y3.shape, y3_ref.shape)
    np.testing.assert_allclose(np.asarray(y3, dtype=np.float32),
                               np.asarray(y3_ref, dtype=np.float32),
                               rtol=2e-2, atol=2e-2)

    print("KERNEL_OK")
</pallas_src>

<mosaic_0001>
module attributes {stable_mosaic.version = 11 : i64} {
  func.func @kernel(%arg0: i32, %arg1: i32, %arg2: i32, %arg3: memref<2x4x256xf32, #tpu.memory_space<vmem>>, %arg4: memref<2x256xf32, #tpu.memory_space<vmem>>) attributes {dimension_semantics = [#tpu.dimension_semantics<parallel>, #tpu.dimension_semantics<parallel>, #tpu.dimension_semantics<arbitrary>], iteration_bounds = array<i64: 1, 1, 1>, scalar_prefetch = 0 : i64, scratch_operands = 0 : i64, tpu.core_type = #tpu.core_type<tc>, window_params = [{transform_indices = @transform_0, window_bounds = array<i64: 2, 4, 256>}, {transform_indices = @transform_1, window_bounds = array<i64: 2, 256>}]} {
    %c0_i32 = arith.constant 0 : i32
    %0 = arith.cmpi eq, %arg2, %c0_i32 : i32
    %1 = arith.extui %0 : i1 to i32
    %c0_i32_0 = arith.constant 0 : i32
    %2 = arith.cmpi ne, %1, %c0_i32_0 : i32
    scf.if %2 {
      %cst_9 = arith.constant 0.000000e+00 : f32
      %11 = vector.broadcast %cst_9 : f32 to vector<2x256xf32>
      %c0_10 = arith.constant 0 : index
      %c0_11 = arith.constant 0 : index
      %12 = vector.load %arg4[%c0_10, %c0_11] : memref<2x256xf32, #tpu.memory_space<vmem>>, vector<2x256xf32>
      tpu.vector_store %arg4[%c0_10, %c0_11], %11 {strides = array<i32>} : memref<2x256xf32, #tpu.memory_space<vmem>>, vector<2x256xf32>,
    } else {
    }
    %c0 = arith.constant 0 : index
    %c0_1 = arith.constant 0 : index
    %c0_2 = arith.constant 0 : index
    %3 = vector.load %arg3[%c0, %c0_1, %c0_2] : memref<2x4x256xf32, #tpu.memory_space<vmem>>, vector<2x4x256xf32>
    %c0_3 = arith.constant 0 : index
    %c0_4 = arith.constant 0 : index
    %4 = vector.load %arg4[%c0_3, %c0_4] : memref<2x256xf32, #tpu.memory_space<vmem>>, vector<2x256xf32>
    %cst = arith.constant dense<0.000000e+00> : vector<2x256xf32>
    %5 = vector.multi_reduction <add>, %3, %cst [1] : vector<2x4x256xf32> to vector<2x256xf32>
    %6 = arith.addf %4, %5 : vector<2x256xf32>
    %c0_5 = arith.constant 0 : index
    %c0_6 = arith.constant 0 : index
    %7 = vector.load %arg4[%c0_5, %c0_6] : memref<2x256xf32, #tpu.memory_space<vmem>>, vector<2x256xf32>
    tpu.vector_store %arg4[%c0_5, %c0_6], %6 {strides = array<i32>} : memref<2x256xf32, #tpu.memory_space<vmem>>, vector<2x256xf32>,
    %c0_i32_7 = arith.constant 0 : i32
    %8 = arith.cmpi eq, %arg2, %c0_i32_7 : i32
    %9 = arith.extui %8 : i1 to i32
    %c0_i32_8 = arith.constant 0 : i32
    %10 = arith.cmpi ne, %9, %c0_i32_8 : i32
    scf.if %10 {
      %c0_9 = arith.constant 0 : index
      %c0_10 = arith.constant 0 : index
      %11 = vector.load %arg4[%c0_9, %c0_10] : memref<2x256xf32, #tpu.memory_space<vmem>>, vector<2x256xf32>
      %cst_11 = arith.constant 2.500000e-01 : f32
      %12 = vector.broadcast %cst_11 : f32 to vector<2x256xf32>
      %13 = arith.mulf %11, %12 : vector<2x256xf32>
      %c0_12 = arith.constant 0 : index
      %c0_13 = arith.constant 0 : index
      %14 = vector.load %arg4[%c0_12, %c0_13] : memref<2x256xf32, #tpu.memory_space<vmem>>, vector<2x256xf32>
      tpu.vector_store %arg4[%c0_12, %c0_13], %13 {strides = array<i32>} : memref<2x256xf32, #tpu.memory_space<vmem>>, vector<2x256xf32>,
    } else {
    }
    return
  }
  func.func @transform_0(%arg0: i32, %arg1: i32, %arg2: i32) -> (i32, i32, i32) {
    %c0_i32 = arith.constant 0 : i32
    return %arg0, %arg2, %arg1 : i32, i32, i32
  }
  func.func @transform_1(%arg0: i32, %arg1: i32, %arg2: i32) -> (i32, i32) {
    %c0_i32 = arith.constant 0 : i32
    return %arg0, %arg1 : i32, i32
  }
}

</mosaic_0001>

<bundles_post_ra>
// kernel: tpu_custom_call.1
= control target key start
LH: loop header
LB: loop body
LE: loop exit
PB: predicated region body
PF: predicated region fallthrough
CT: control target
= control target key end

     0   :  { %6 = vsyncpa [#allocation3], 0  ;;  %s219_s0 = inlined_call_operand.hbm [shape: f32[2,4,256], index: 0, kind: input, shape index: {}]   ;;  %s220_s1 = inlined_call_operand.hbm [shape: f32[2,256], index: 1, kind: output, shape index: {}]  }
   0x1   :  { %7 = vsyncpa [#allocation4], 0  ;;  %s179_s6 = smov [#allocation2]   ;;  %s131_s10 = scalar_lea.hbm %s219_s0, 256 }
   0x2   :  { %s13_s7 = sshll.u32 %s179_s6, 4  ;;  %p132_p0 = scmp.ne.s32.totalorder %s219_s0, %s131_s10  ;;  %s14_s7 = int_to_ptr.vmem [resolvable:$true] %s13_s7 }
   0x3   :  { %p135_p1 = scmp.lt.u32.totalorder %s131_s10, %s219_s0 }
   0x5   :  { %p137_p2 = pnand %p135_p1, %p132_p0 }
   0x7   :  { %140 = shalt.err (!%p137_p2)
}
   0x8   :  { %s141_s15 = scalar_lea.vmem %s14_s7, 256  ;;  %p146_p4 = scmp.lt.s32.totalorder %s14_s7, %s14_s7 }
   0x9   :  { %p142_p3 = scmp.ne.s32.totalorder %s14_s7, %s141_s15  ;;  %p147_p5 = scmp.lt.s32.totalorder %s141_s15, %s141_s15 }
   0xb   :  { %p148_p6 = por %p147_p5, %p146_p4 }
   0xd   :  { %p149_p7 = pnand %p148_p6, %p142_p3 }
   0xf   :  { %152 = shalt.err (!%p149_p7)
}
  0x10   :  { %s180_s16 = smov 128   ;;  %s181_s17 = smov 8  }
  0x11   :  { %19 = dma.hbm_to_vmem [thread:$0]  %s219_s0, 256, %s14_s7, [#allocation3], %s180_s16, %s180_s16, %s181_s17  }
  0x12   :  { %175 = dma.done.wait [#allocation3], 256  }
  0x13   :  { %176 = vsyncadd [#allocation3], 4294967040  ;;  %v182_v0 = vmov 0.0   ;;  %vm37_vm0 = vcmask 1043456   ;;  %v28_v1 = vld [vmem:[#allocation2] sm:$0xff]  ;;  %v29_v2 = vld [vmem:[#allocation2 + $0x8] sm:$0xff]  ;;  %v74_v17 = vlaneseq }
  0x14   :  { %27 = vst [vmem:[#allocation5] sm:$0xf] %v182_v0  ;;  %v33_v3 = vcombine.high %v28_v1, %v28_v1  ;;  %v34_v4 = vcombine.high %v29_v2, %v29_v2  ;;  %v38_v5 = vsel %vm37_vm0, %v28_v1, 0.0  ;;  %v52_v6 = vsel %vm37_vm0, %v29_v2, 0.0  ;;  %s184_s0 = smov [#allocation5]  }
  0x15   :  { %v39_v7 = vrot.slane %v38_v5, 4  ;;  %v53_v8 = vrot.slane %v52_v6, 4  ;;  %v183_v15 = vmov 1983009808   ;;  %v75_v27 = vshrl.u32 %v74_v17, 7  ;;  %s114_s20 = sshll.u32 %s184_s0, 4  ;;  %s115_s20 = int_to_ptr.vmem [resolvable:$true] %s114_s20 }
  0x16   :  { %v45_v9 = vsel %vm37_vm0, %v33_v3, 0.0  ;;  %v59_v10 = vsel %vm37_vm0, %v34_v4, 0.0  ;;  %v72_v16 = vunpack.c.l.s4 %v183_v15  ;;  %vm91_vm1 = vcmask 1041409   ;;  %s153_s21 = scalar_lea.vmem %s115_s20, 64  ;;  %p158_p9 = scmp.lt.s32.totalorder %s115_s20, %s115_s20 }
  0x17   :  { %v40_v11 = vadd.f32 %v39_v7, %v38_v5  ;;  %v46_v12 = vrot.slane %v45_v9, 4  ;;  %v54_v13 = vadd.f32 %v53_v8, %v52_v6  ;;  %v60_v14 = vrot.slane %v59_v10, 4  ;;  %p154_p8 = scmp.ne.s32.totalorder %s115_s20, %s153_s21  ;;  %p159_p10 = scmp.lt.s32.totalorder %s153_s21, %s153_s21 }
  0x18   :  { %v73_v26 = vunpack.c.0.s8 %v72_v16  ;;  %vm93_vm2 = vcmask 1043459   ;;  %vm95_vm3 = vcmask 1045509   ;;  %vm97_vm4 = vcmask 1047559  }
  0x19   :  { %v41_v18 = vrot.slane %v40_v11, 2  ;;  %v47_v19 = vadd.f32 %v46_v12, %v45_v9  ;;  %v55_v20 = vrot.slane %v54_v13, 2  ;;  %v61_v21 = vadd.f32 %v60_v14, %v59_v10  ;;  %p160_p11 = por %p159_p10, %p158_p9 }
  0x1a   :  { %v76_v38 = vsub.s32 %v73_v26, %v75_v27 }
  0x1b   :  { %v42_v22 = vadd.f32 %v41_v18, %v40_v11  ;;  %v48_v23 = vrot.slane %v47_v19, 2  ;;  %v56_v24 = vadd.f32 %v55_v20, %v54_v13  ;;  %v62_v25 = vrot.slane %v61_v21, 2  ;;  %v30_v45 = vld [vmem:[#allocation5] sm:$0xf]  ;;  %p161_p12 = pnand %p160_p11, %p154_p8 }
  0x1d   :  { %v43_v28 = vrot.slane %v42_v22, 1  ;;  %v49_v29 = vadd.f32 %v48_v23, %v47_v19  ;;  %v57_v30 = vrot.slane %v56_v24, 1  ;;  %v63_v31 = vadd.f32 %v62_v25, %v61_v21 }
  0x1f   :  { %v44_v32 = vadd.f32 %v43_v28, %v42_v22  ;;  %v50_v33 = vrot.slane %v49_v29, 1  ;;  %v58_v34 = vadd.f32 %v57_v30, %v56_v24  ;;  %v64_v35 = vrot.slane %v63_v31, 1 }
  0x21   :  { %v51_v36 = vadd.f32 %v50_v33, %v49_v29  ;;  %v65_v37 = vadd.f32 %v64_v35, %v63_v31 }
  0x23   :  { %v70_v39 = vcombine.low %v44_v32, %v51_v36  ;;  %v78_v40 = vcombine.low %v58_v34, %v65_v37 }
  0x25   :  { %v77_v41 = vrot.slane %v70_v39, %v76_v38  ;;  %v85_v42 = vrot.slane %v78_v40, %v76_v38 }
  0x27   :  { %v90_v43 = vrot.slane %v85_v42, 7 }
  0x29   :  { %v92_v44 = vsel %vm91_vm1, %v90_v43, %v77_v41 }
  0x2a   :  { %v94_v46 = vsel %vm93_vm2, %v90_v43, %v92_v44 }
  0x2b   :  { %v96_v47 = vsel %vm95_vm3, %v90_v43, %v94_v46 }
  0x2c   :  { %v98_v48 = vsel %vm97_vm4, %v90_v43, %v96_v47 }
  0x2d   :  { %v100_v49 = vadd.f32 %v98_v48, %v30_v45 }
  0x2f   :  { %101 = vst [vmem:[#allocation5] sm:$0xf] %v100_v49 }
  0x36   :  { %v105_v50 = vld [vmem:[#allocation5] sm:$0xf] }
  0x37   :  { %v106_v51 = vmul.f32 0.25, %v105_v50 }
  0x39   :  { %107 = vst [vmem:[#allocation5] sm:$0xf] %v106_v51 }
  0x3a   :  { %164 = shalt.err (!%p161_p12)
}
  0x3b   :  { %s165_s24 = scalar_lea.hbm %s220_s1, 64 }
  0x3c   :  { %p166_p13 = scmp.ne.s32.totalorder %s220_s1, %s165_s24  ;;  %p169_p0 = scmp.lt.u32.totalorder %s165_s24, %s220_s1 }
  0x3e   :  { %p171_p1 = pnand %p169_p0, %p166_p13 }
  0x40   :  { %174 = shalt.err (!%p171_p1)
}
  0x41   :  { %117 = dma.vmem_to_hbm [thread:$0]  %s115_s20, 64, %s220_s1, [#allocation4]  }
  0x42   :  { %177 = dma.done.wait [#allocation4], 64  }
  0x43   :  { %178 = vsyncadd [#allocation4], 4294967232 }
  0x44   :  { %121 = vsyncpa [#allocation3], 1 }
  0x45   :  { %122 = vsyncpa [#allocation4], 1 }

</bundles_post_ra>
